<compile_context>
chip_gen: v7x
topology: tpu7x:2x2x1
jax: 0.10.0
libtpu: 0.0.40
codegen_flags: <defaults>
</compile_context>

<pallas_src>
import functools

import jax
import jax.numpy as jnp
from jax.experimental import pallas as pl
from jax.experimental.pallas import tpu as pltpu


def _vmem_capacity_bytes():
    try:
        return int(pltpu.get_tpu_info().vmem_capacity_bytes)
    except Exception:
        # Conservative fallback sized for the smallest generation (v7x: 64 MiB).
        return 64 * 1024 * 1024


def _normalize_padding(padding):
    if isinstance(padding, tuple):
        assert len(padding) == 3, "padding tuple must be (pad_d, pad_h, pad_w)"
        pd, ph, pw = (int(p) for p in padding)
    else:
        pd = ph = pw = int(padding)
    assert pd >= 0 and ph >= 0 and pw >= 0
    return pd, ph, pw


def _store_repeated_rows(o_ref, row, d0, dd, h_start, count, chunk=8):
    """Store `count` replicated copies of row (TB, dd, 1, Wo) along H.

    Chunked static stores (<= chunk rows each) bound the vreg live range for
    large pads instead of materializing one huge broadcast.
    """
    tb, _, _, wo = row.shape
    r = 0
    while r < count:
        c = min(chunk, count - r)
        o_ref[:, d0:d0 + dd, h_start + r:h_start + r + c, :] = (
            jnp.broadcast_to(row, (tb, dd, c, wo)))
        r += c


def _store_repeated_depth(o_ref, sl, d_start, count, chunk=4):
    """Store `count` replicated copies of slice sl (TB, 1, Ho, Wo) along D."""
    tb, _, ho, wo = sl.shape
    r = 0
    while r < count:
        c = min(chunk, count - r)
        o_ref[:, d_start + r:d_start + r + c, :, :] = (
            jnp.broadcast_to(sl, (tb, c, ho, wo)))
        r += c


def _replication_pad3d_kernel(x_ref, o_ref, *, pd, ph, pw, d_tiled):
    """Edge-replication pad of a (TB, DD, H, W) block.

    d_tiled=False: DD == D and the output block is the full (TB, Do, Ho, Wo).
    d_tiled=True : DD == 1 (one output-depth slice); only H/W pads are applied.
    All slice bounds are Python ints, so every region lowers to static stores.
    """
    x = x_ref[...]                       # (TB, DD, H, W)
    tb, dd, h, w = x.shape
    wo = w + 2 * pw

    # 1) W (lane) padding built in vregs -> the dominant store below is a single
    #    lane-aligned, full-width store instead of three lane-offset/masked ones.
    if pw > 0:
        left = jnp.broadcast_to(x[:, :, :, 0:1], (tb, dd, h, pw))
        right = jnp.broadcast_to(x[:, :, :, w - 1:w], (tb, dd, h, pw))
        xw = jnp.concatenate([left, x, right], axis=-1)      # (TB, DD, H, Wo)
    else:
        xw = x

    d0 = 0 if d_tiled else pd            # depth offset of the interior rows
    o_ref[:, d0:d0 + dd, ph:ph + h, :] = xw

    # 2) H (sublane) padding, derived from xw (no read-back of o_ref).
    if ph > 0:
        _store_repeated_rows(o_ref, xw[:, :, 0:1, :], d0, dd, 0, ph)
        _store_repeated_rows(o_ref, xw[:, :, h - 1:h, :], d0, dd, ph + h, ph)

    # 3) D padding (whole-depth path only), also derived from xw.
    if (not d_tiled) and pd > 0:
        for src, d_start in ((xw[:, 0:1, :, :], 0),
                             (xw[:, dd - 1:dd, :, :], pd + dd)):
            if ph > 0:
                top = jnp.broadcast_to(src[:, :, 0:1, :], (tb, 1, ph, wo))
                bot = jnp.broadcast_to(src[:, :, h - 1:h, :], (tb, 1, ph, wo))
                full = jnp.concatenate([top, src, bot], axis=2)  # (TB,1,Ho,Wo)
            else:
                full = src
            _store_repeated_depth(o_ref, full, d_start, pd)


def replication_pad3d(x, padding, *, _force_depth_tiled=False):
    """Equivalent of the PyTorch ReplicationPad3d module's forward.

    x: (N, C, D, H, W)
    padding: int or 3-tuple (pad_d, pad_h, pad_w), symmetric per dim
    returns: (N, C, D + 2*pd, H + 2*ph, W + 2*pw)
    """
    pd, ph, pw = _normalize_padding(padding)
    N, C, D, H, W = x.shape
    Do, Ho, Wo = D + 2 * pd, H + 2 * ph, W + 2 * pw

    NC = N * C
    x_flat = x.reshape(NC, D, H, W)
    itemsize = jnp.dtype(x.dtype).itemsize

    # Per-generation VMEM budget: ~128 MiB on v5e/v6e, 64 MiB on v7x.
    vmem_limit = int(0.75 * _vmem_capacity_bytes())

    def _max_tb(per_in, per_tmp, per_out):
        # 2x for the double-buffered in/out pipeline blocks, plus one block of
        # in-kernel temporaries (the lane-concat W-padded band).
        per_slice = (2 * (per_in + per_out) + per_tmp) * itemsize
        return vmem_limit // per_slice

    bytes_accessed = NC * (D * H * W + Do * Ho * Wo) * itemsize

    max_tb = _max_tb(D * H * W, D * H * Wo, Do * Ho * Wo)

    if max_tb >= 1 and not _force_depth_tiled:
        # --- Main path: whole depth per block, grid over NC only. ---
        tb = min(max_tb, NC)
        if NC >= 4:
            # Keep >= ~4 grid steps so v7x's two TensorCores both get work and
            # DMA stays overlapped with compute.
            tb = min(tb, max(1, NC // 4))
        grid = (pl.cdiv(NC, tb),)        # ragged last block is fine: rows are
                                         # independent and OOB rows aren't written.
        kernel = functools.partial(
            _replication_pad3d_kernel, pd=pd, ph=ph, pw=pw, d_tiled=False)
        in_specs = [pl.BlockSpec((tb, D, H, W), lambda i: (i, 0, 0, 0))]
        out_specs = pl.BlockSpec((tb, Do, Ho, Wo), lambda i: (i, 0, 0, 0))
        dim_sem = ("parallel",)
    else:
        # --- Fallback: depth-tiled path for volumes too large per slice. ---
        # One output-depth slice per step; input map clamps to the edge slice.
        max_tb = _max_tb(H * W, H * Wo, Ho * Wo)
        tb = max(1, min(max_tb, NC))
        # TODO(synk): if a single (Ho, Wo) slice still exceeds the VMEM budget,
        # tile H as well with the same clamped-index trick.
        grid = (pl.cdiv(NC, tb), Do)
        kernel = functools.partial(
            _replication_pad3d_kernel, pd=pd, ph=ph, pw=pw, d_tiled=True)
        in_specs = [pl.BlockSpec(
            (tb, 1, H, W),
            lambda i, j: (i, jnp.clip(j - pd, 0, D - 1), 0, 0))]
        out_specs = pl.BlockSpec((tb, 1, Ho, Wo), lambda i, j: (i, j, 0, 0))
        dim_sem = ("parallel", "parallel")

    out_flat = pl.pallas_call(
        kernel,
        out_shape=jax.ShapeDtypeStruct((NC, Do, Ho, Wo), x.dtype),
        grid=grid,
        in_specs=in_specs,
        out_specs=out_specs,
        compiler_params=pltpu.CompilerParams(
            dimension_semantics=dim_sem,
            vmem_limit_bytes=vmem_limit,
        ),
        cost_estimate=pl.CostEstimate(
            flops=0, transcendentals=0, bytes_accessed=bytes_accessed),
    )(x_flat)

    return out_flat.reshape(N, C, Do, Ho, Wo)


def _reference(x, padding):
    pd, ph, pw = _normalize_padding(padding)
    return jnp.pad(
        x, ((0, 0), (0, 0), (pd, pd), (ph, ph), (pw, pw)), mode="edge")


if __name__ == "__main__":
    key = jax.random.PRNGKey(0)
    k1, k2 = jax.random.split(key)

    # Small NCDHW inputs: batch=2, channels=3, depth=4, height=6, width=8
    x = jax.random.normal(k1, (2, 3, 4, 6, 8), dtype=jnp.float32)
    # NC=11 (prime) exercises the ragged last block of the cdiv grid.
    x2 = jax.random.normal(k2, (1, 11, 3, 6, 8), dtype=jnp.float32)

    for arr, padding in [(x, (1, 2, 3)), (x, 1), (x, 0), (x2, (1, 1, 2))]:
        out = jax.block_until_ready(replication_pad3d(arr, padding))
        ref = _reference(arr, padding)
        assert out.shape == ref.shape, (out.shape, ref.shape)
        assert jnp.allclose(out, ref), f"mismatch vs reference, padding={padding}"

    # Also exercise the depth-tiled fallback path (used for huge volumes).
    out = jax.block_until_ready(
        replication_pad3d(x, (2, 1, 2), _force_depth_tiled=True))
    ref = _reference(x, (2, 1, 2))
    assert jnp.allclose(out, ref), "mismatch vs reference (depth-tiled path)"

    print("KERNEL_OK")
</pallas_src>

<mosaic_0001>
module attributes {stable_mosaic.version = 11 : i64} {
  func.func @_replication_pad3d_kernel(%arg0: i32, %arg1: memref<1x4x6x8xf32, #tpu.memory_space<vmem>>, %arg2: memref<1x6x10x14xf32, #tpu.memory_space<vmem>>) attributes {dimension_semantics = [#tpu.dimension_semantics<parallel>], iteration_bounds = array<i64: 6>, scalar_prefetch = 0 : i64, scratch_operands = 0 : i64, tpu.core_type = #tpu.core_type<tc>, window_params = [{transform_indices = @transform_0, window_bounds = array<i64: 1, 4, 6, 8>}, {transform_indices = @transform_1, window_bounds = array<i64: 1, 6, 10, 14>}]} {
    %c0 = arith.constant 0 : index
    %c0_0 = arith.constant 0 : index
    %c0_1 = arith.constant 0 : index
    %c0_2 = arith.constant 0 : index
    %0 = vector.load %arg1[%c0, %c0_0, %c0_1, %c0_2] : memref<1x4x6x8xf32, #tpu.memory_space<vmem>>, vector<1x4x6x8xf32>
    %1 = vector.extract_strided_slice %0 {offsets = [0, 0, 0, 0], sizes = [1, 4, 6, 1], strides = [1, 1, 1, 1]} : vector<1x4x6x8xf32> to vector<1x4x6x1xf32>
    %2 = vector.shape_cast %1 : vector<1x4x6x1xf32> to vector<1x4x6x1xf32>
    %3 = vector.broadcast %2 : vector<1x4x6x1xf32> to vector<1x4x6x3xf32>
    %4 = vector.extract_strided_slice %0 {offsets = [0, 0, 0, 7], sizes = [1, 4, 6, 1], strides = [1, 1, 1, 1]} : vector<1x4x6x8xf32> to vector<1x4x6x1xf32>
    %5 = vector.shape_cast %4 : vector<1x4x6x1xf32> to vector<1x4x6x1xf32>
    %6 = vector.broadcast %5 : vector<1x4x6x1xf32> to vector<1x4x6x3xf32>
    %7 = tpu.concatenate %3, %0, %6 in 3 : vector<1x4x6x3xf32>, vector<1x4x6x8xf32>, vector<1x4x6x3xf32> -> vector<1x4x6x14xf32>
    %c0_3 = arith.constant 0 : index
    %c1 = arith.constant 1 : index
    %c2 = arith.constant 2 : index
    %c0_4 = arith.constant 0 : index
    %8 = vector.load %arg2[%c0_3, %c1, %c2, %c0_4] : memref<1x6x10x14xf32, #tpu.memory_space<vmem>>, vector<1x4x6x14xf32>
    tpu.vector_store %arg2[%c0_3, %c1, %c2, %c0_4], %7 {strides = array<i32>} : memref<1x6x10x14xf32, #tpu.memory_space<vmem>>, vector<1x4x6x14xf32>,
    %9 = vector.extract_strided_slice %7 {offsets = [0, 0, 0, 0], sizes = [1, 4, 1, 14], strides = [1, 1, 1, 1]} : vector<1x4x6x14xf32> to vector<1x4x1x14xf32>
    %10 = vector.shape_cast %9 : vector<1x4x1x14xf32> to vector<1x4x1x14xf32>
    %11 = vector.broadcast %10 : vector<1x4x1x14xf32> to vector<1x4x2x14xf32>
    %c0_5 = arith.constant 0 : index
    %c1_6 = arith.constant 1 : index
    %c0_7 = arith.constant 0 : index
    %c0_8 = arith.constant 0 : index
    %12 = vector.load %arg2[%c0_5, %c1_6, %c0_7, %c0_8] : memref<1x6x10x14xf32, #tpu.memory_space<vmem>>, vector<1x4x2x14xf32>
    tpu.vector_store %arg2[%c0_5, %c1_6, %c0_7, %c0_8], %11 {strides = array<i32>} : memref<1x6x10x14xf32, #tpu.memory_space<vmem>>, vector<1x4x2x14xf32>,
    %13 = vector.extract_strided_slice %7 {offsets = [0, 0, 5, 0], sizes = [1, 4, 1, 14], strides = [1, 1, 1, 1]} : vector<1x4x6x14xf32> to vector<1x4x1x14xf32>
    %14 = vector.shape_cast %13 : vector<1x4x1x14xf32> to vector<1x4x1x14xf32>
    %15 = vector.broadcast %14 : vector<1x4x1x14xf32> to vector<1x4x2x14xf32>
    %c0_9 = arith.constant 0 : index
    %c1_10 = arith.constant 1 : index
    %c8 = arith.constant 8 : index
    %c0_11 = arith.constant 0 : index
    %16 = vector.load %arg2[%c0_9, %c1_10, %c8, %c0_11] : memref<1x6x10x14xf32, #tpu.memory_space<vmem>>, vector<1x4x2x14xf32>
    tpu.vector_store %arg2[%c0_9, %c1_10, %c8, %c0_11], %15 {strides = array<i32>} : memref<1x6x10x14xf32, #tpu.memory_space<vmem>>, vector<1x4x2x14xf32>,
    %17 = vector.extract_strided_slice %7 {offsets = [0, 0, 0, 0], sizes = [1, 1, 6, 14], strides = [1, 1, 1, 1]} : vector<1x4x6x14xf32> to vector<1x1x6x14xf32>
    %18 = vector.extract_strided_slice %7 {offsets = [0, 3, 0, 0], sizes = [1, 1, 6, 14], strides = [1, 1, 1, 1]} : vector<1x4x6x14xf32> to vector<1x1x6x14xf32>
    %19 = vector.extract_strided_slice %17 {offsets = [0, 0, 0, 0], sizes = [1, 1, 1, 14], strides = [1, 1, 1, 1]} : vector<1x1x6x14xf32> to vector<1x1x1x14xf32>
    %20 = vector.shape_cast %19 : vector<1x1x1x14xf32> to vector<1x1x1x14xf32>
    %21 = vector.broadcast %20 : vector<1x1x1x14xf32> to vector<1x1x2x14xf32>
    %22 = vector.extract_strided_slice %17 {offsets = [0, 0, 5, 0], sizes = [1, 1, 1, 14], strides = [1, 1, 1, 1]} : vector<1x1x6x14xf32> to vector<1x1x1x14xf32>
    %23 = vector.shape_cast %22 : vector<1x1x1x14xf32> to vector<1x1x1x14xf32>
    %24 = vector.broadcast %23 : vector<1x1x1x14xf32> to vector<1x1x2x14xf32>
    %25 = tpu.concatenate %21, %17, %24 in 2 : vector<1x1x2x14xf32>, vector<1x1x6x14xf32>, vector<1x1x2x14xf32> -> vector<1x1x10x14xf32>
    %c0_12 = arith.constant 0 : index
    %c0_13 = arith.constant 0 : index
    %c0_14 = arith.constant 0 : index
    %c0_15 = arith.constant 0 : index
    %26 = vector.load %arg2[%c0_12, %c0_13, %c0_14, %c0_15] : memref<1x6x10x14xf32, #tpu.memory_space<vmem>>, vector<1x1x10x14xf32>
    tpu.vector_store %arg2[%c0_12, %c0_13, %c0_14, %c0_15], %25 {strides = array<i32>} : memref<1x6x10x14xf32, #tpu.memory_space<vmem>>, vector<1x1x10x14xf32>,
    %27 = vector.extract_strided_slice %18 {offsets = [0, 0, 0, 0], sizes = [1, 1, 1, 14], strides = [1, 1, 1, 1]} : vector<1x1x6x14xf32> to vector<1x1x1x14xf32>
    %28 = vector.shape_cast %27 : vector<1x1x1x14xf32> to vector<1x1x1x14xf32>
    %29 = vector.broadcast %28 : vector<1x1x1x14xf32> to vector<1x1x2x14xf32>
    %30 = vector.extract_strided_slice %18 {offsets = [0, 0, 5, 0], sizes = [1, 1, 1, 14], strides = [1, 1, 1, 1]} : vector<1x1x6x14xf32> to vector<1x1x1x14xf32>
    %31 = vector.shape_cast %30 : vector<1x1x1x14xf32> to vector<1x1x1x14xf32>
    %32 = vector.broadcast %31 : vector<1x1x1x14xf32> to vector<1x1x2x14xf32>
    %33 = tpu.concatenate %29, %18, %32 in 2 : vector<1x1x2x14xf32>, vector<1x1x6x14xf32>, vector<1x1x2x14xf32> -> vector<1x1x10x14xf32>
    %c0_16 = arith.constant 0 : index
    %c5 = arith.constant 5 : index
    %c0_17 = arith.constant 0 : index
    %c0_18 = arith.constant 0 : index
    %34 = vector.load %arg2[%c0_16, %c5, %c0_17, %c0_18] : memref<1x6x10x14xf32, #tpu.memory_space<vmem>>, vector<1x1x10x14xf32>
    tpu.vector_store %arg2[%c0_16, %c5, %c0_17, %c0_18], %33 {strides = array<i32>} : memref<1x6x10x14xf32, #tpu.memory_space<vmem>>, vector<1x1x10x14xf32>,
    return
  }
  func.func @transform_0(%arg0: i32) -> (i32, i32, i32, i32) {
    %c0_i32 = arith.constant 0 : i32
    %c0_i32_0 = arith.constant 0 : i32
    %c0_i32_1 = arith.constant 0 : i32
    %c0_i32_2 = arith.constant 0 : i32
    return %arg0, %c0_i32, %c0_i32_0, %c0_i32_1 : i32, i32, i32, i32
  }
  func.func @transform_1(%arg0: i32) -> (i32, i32, i32, i32) {
    %c0_i32 = arith.constant 0 : i32
    %c0_i32_0 = arith.constant 0 : i32
    %c0_i32_1 = arith.constant 0 : i32
    %c0_i32_2 = arith.constant 0 : i32
    return %arg0, %c0_i32, %c0_i32_0, %c0_i32_1 : i32, i32, i32, i32
  }
}

</mosaic_0001>

<bundles_post_ra>
// kernel: tpu_custom_call.1
= control target key start
LH: loop header
LB: loop body
LE: loop exit
PB: predicated region body
PF: predicated region fallthrough
CT: control target
= control target key end

     0   :  { %s358_s6 = smov 0   ;;  %s423_s0 = inlined_call_operand.vmem [shape: f32[6,4,6,8], index: 0, kind: input, shape index: {}]   ;;  %s424_s1 = inlined_call_operand.vmem [shape: f32[6,6,10,14], index: 1, kind: output, shape index: {}]  }
   0x1 LB: > { %s296_s7 = sadd.s32 4294967295, %s343_s6   ;;  %p300_p0 = scmp.ge.s32.totalorder %s343_s6, 1  ;;  %s343_s6 = sphi %s358_s6, %s11_s6  }
   0x2   : > { %p87_p1 = scmp.lt.s32.totalorder %s343_s6, 7 }
   0x4   : > { %p88_p2 = pnand %p300_p0, %p87_p1 }
   0x5   : > { %p107_p3 = scmp.lt.s32.totalorder (!%p88_p2), %s296_s7, 5  ;;  %v345_v0 = vmov (!%p88_p2), 0   ;;  %v346_v5 = vmov (!%p88_p2), 7   ;;  %s347_s12 = smov (!%p88_p2), 3   ;;  %v185_v10 = vlaneseq (!%p88_p2)  ;;  %vm169_vm0 = vcmask (!%p88_p2), 23552  }
   0x6   : > { %91 = sbr.rel (%p88_p2) target bundleno = 173 (0xad), region = 24  ;;  %334 = vset.pattern.permute.xlu1 (!%p88_p2), %v345_v0  ;;  %333 = vset.pattern.permute.xlu0 (!%p88_p2), %v345_v0  ;;  %vm174_vm1 = vcmask (!%p88_p2), 89088   ;;  %vm180_vm2 = vcmask (!%p88_p2), 111616   ;;  %vm201_vm3 = vcmask (!%p88_p2), 107520   ;;  %vm229_vm4 = vcmask (!%p88_p2), 1041408  }
   0x7   : > { %v186_v13 = vshrl.u32 (!%p88_p2), %v185_v10, 7  ;;  %vm231_vm5 = vcmask (!%p88_p2), 113664  }
   0x9   : > { %v187_v16 = vsub.s32 (!%p88_p2), 0, %v186_v13  ;;  %v208_v17 = vsub.s32 (!%p88_p2), 5, %v186_v13 }
   0xd   : > { %s426_s7 = smov (!%p107_p3, %s296_s7), 5 }
   0xe   : > { %s320_s8 = sshll.u32 %s426_s7, 5  ;;  %s321_s13 = smul.u32 96, %s426_s7 }
   0xf   : > { %s111_s11 = scalar_lea.vmem %s423_s0, %s320_s8 }
  0x10   : > { %v118_v1 = vld [vmem:[%s111_s11 + $0x8] sm:$0x3f]  ;;  %v117_v2 = vld [vmem:[%s111_s11] sm:$0x3f]  ;;  %v119_v3 = vld [vmem:[%s111_s11 + $0x10] sm:$0x3f]  ;;  %s376_s16 = scalar_lea.vmem %s424_s1, %s321_s13 }
  0x11   : > { %128 = vperm.xlu1 %334, %v118_v1   ;;  %123 = vperm.xlu0 %333, %v117_v2   ;;  %v120_v4 = vld [vmem:[%s111_s11 + $0x18] sm:$0x3f] }
  0x15   : > { %133 = vperm.xlu1 %334, %v119_v3   ;;  %138 = vperm.xlu0 %333, %v120_v4  }
  0x19   : > { %336 = vset.pattern.permute.xlu1 %v346_v5  ;;  %335 = vset.pattern.permute.xlu0 %v346_v5 }
  0x1a   : > { %154 = vperm.xlu1 %336, %v120_v4   ;;  %142 = vperm.xlu0 %335, %v117_v2  }
  0x1e   : > { %146 = vperm.xlu1 %336, %v118_v1   ;;  %150 = vperm.xlu0 %335, %v119_v3  }
  0x22   : > { %157 = vrot.lane.b32.xlu1 %v117_v2, %s347_s12  ;;  %163 = vrot.lane.b32.xlu0 %v120_v4, %s347_s12 }
  0x26   : > { %159 = vrot.lane.b32.xlu1 %v118_v1, %s347_s12  ;;  %161 = vrot.lane.b32.xlu0 %v119_v3, %s347_s12 }
  0x90   : > { %v129_v6 = vpop.permute.xlu1 %128  ;;  %v124_v7 = vpop.permute.xlu0 %123 }
  0x94   : > { %v134_v8 = vpop.permute.xlu1 %133  ;;  %v139_v9 = vpop.permute.xlu0 %138 }
  0x99   : > { %v155_v11 = vpop.permute.xlu1 %154  ;;  %v143_v12 = vpop.permute.xlu0 %142 }
  0x9d   : > { %v147_v14 = vpop.permute.xlu1 %146  ;;  %v151_v15 = vpop.permute.xlu0 %150 }
  0xa1   : > { %v158_v18 = vpop.permute.xlu1 %157  ;;  %v164_v19 = vpop.permute.xlu0 %163 }
  0xa2   : > { %v170_v20 = vsel %vm169_vm0, %v124_v7, %v158_v18  ;;  %v173_v21 = vsel %vm169_vm0, %v139_v9, %v164_v19 }
  0xa3   : > { %v175_v22 = vsel %vm174_vm1, %v170_v20, %v143_v12  ;;  %v178_v23 = vsel %vm174_vm1, %v173_v21, %v155_v11 }
  0xa4   : > { %304 = vst.msk [vmem:[%s376_s16 + $0x12] sm:$0x3f] %vm180_vm2, %v175_v22  ;;  %v188_v24 = vrot.slane %v175_v22, %v187_v16  ;;  %v209_v25 = vrot.slane %v175_v22, %v208_v17  ;;  %v227_v26 = vrot.slane %v175_v22, 6  ;;  %307 = vst.msk [vmem:[%s376_s16 + $0x42] sm:$0x3f] %vm180_vm2, %v178_v23  ;;  %v200_v27 = vrot.slane %v178_v23, %v187_v16 }
  0xa5   : > { %v221_v28 = vrot.slane %v178_v23, %v208_v17  ;;  %v235_v29 = vrot.slane %v178_v23, 6  ;;  %v160_v30 = vpop.permute.xlu1 %159  ;;  %v162_v31 = vpop.permute.xlu0 %161 }
  0xa6   : > { %308 = vst.msk [vmem:[%s376_s16 + $0x10] sm:$0x3] %vm201_vm3, %v188_v24  ;;  %312 = vst.msk [vmem:[%s376_s16 + $0x18] sm:$0x3] %vm201_vm3, %v209_v25  ;;  %v230_v32 = vsel %vm229_vm4, %v188_v24, %v227_v26  ;;  %v171_v33 = vsel %vm169_vm0, %v129_v6, %v160_v30  ;;  %v172_v34 = vsel %vm169_vm0, %v134_v8, %v162_v31 }
  0xa7   : > { %233 = vst.msk [vmem:[%s376_s16 + $0x8] sm:$0x3] %vm201_vm3, %v209_v25  ;;  %311 = vst.msk [vmem:[%s376_s16 + $0x40] sm:$0x3] %vm201_vm3, %v200_v27  ;;  %v237_v35 = vsel %vm229_vm4, %v200_v27, %v235_v29  ;;  %v176_v36 = vsel %vm174_vm1, %v171_v33, %v147_v14  ;;  %v177_v37 = vsel %vm174_vm1, %v172_v34, %v151_v15 }
  0xa8   : > { %232 = vst.msk [vmem:[%s376_s16] sm:$0xff] %vm231_vm5, %v230_v32  ;;  %316 = vst.msk [vmem:[%s376_s16 + $0x50] sm:$0xff] %vm231_vm5, %v237_v35  ;;  %v192_v38 = vrot.slane %v176_v36, %v187_v16  ;;  %v213_v39 = vrot.slane %v176_v36, %v208_v17  ;;  %v196_v40 = vrot.slane %v177_v37, %v187_v16 }
  0xa9   : > { %315 = vst.msk [vmem:[%s376_s16 + $0x48] sm:$0x3] %vm201_vm3, %v221_v28  ;;  %317 = vst.msk [vmem:[%s376_s16 + $0x58] sm:$0x3] %vm201_vm3, %v221_v28  ;;  %v217_v41 = vrot.slane %v177_v37, %v208_v17 }
  0xaa   : > { %305 = vst.msk [vmem:[%s376_s16 + $0x22] sm:$0x3f] %vm180_vm2, %v176_v36  ;;  %306 = vst.msk [vmem:[%s376_s16 + $0x32] sm:$0x3f] %vm180_vm2, %v177_v37 }
  0xab   : > { %309 = vst.msk [vmem:[%s376_s16 + $0x20] sm:$0x3] %vm201_vm3, %v192_v38  ;;  %313 = vst.msk [vmem:[%s376_s16 + $0x28] sm:$0x3] %vm201_vm3, %v213_v39 }
  0xac   : > { %310 = vst.msk [vmem:[%s376_s16 + $0x30] sm:$0x3] %vm201_vm3, %v196_v40  ;;  %314 = vst.msk [vmem:[%s376_s16 + $0x38] sm:$0x3] %vm201_vm3, %v217_v41 }
  0xad PF: > { %s11_s6 = sadd.s32 1, %s343_s6  }
  0xae   : > { %p8_p4 = scmp.ge.s32.totalorder %s11_s6, 8  }
  0xb0   :  { %10 = sbr.rel (!%p8_p4) target bundleno = 1 (0x1), region = 56 }

</bundles_post_ra>
